<compile_context>
chip_gen: v7x
topology: tpu7x:2x2x1
jax: 0.10.0
libtpu: 0.0.40
codegen_flags: <defaults>
</compile_context>

<pallas_src>
import jax
import jax.numpy as jnp
from jax.experimental import pallas as pl
from jax.experimental.pallas import tpu as pltpu


def _add_kernel(x_ref, c_ref, o_ref):
    # x_ref: (TR, TC) tile; c_ref: (TR, 1) per-row or (1, TC) per-col constant.
    # Single VPU broadcast-add; DMA is the binding slot, this is free.
    o_ref[...] = x_ref[...] + c_ref[...]


def _cdiv(a: int, b: int) -> int:
    return -(-a // b)


def _round_down(a: int, b: int) -> int:
    return (a // b) * b


def _vmem_budget() -> tuple[int, int]:
    """(target block bytes, vmem_limit cap) tuned per TPU generation."""
    cap = 64 << 20  # conservative default (v7x-class)
    try:
        info = pltpu.get_tpu_info()
        cap = int(getattr(info, "vmem_capacity_bytes", cap))
    except Exception:
        pass
    if cap <= (64 << 20):
        # v7x: 64 MiB/TC -> keep headroom (4 MiB blocks, 48 MiB scoped limit).
        return 4 << 20, 48 << 20
    # v5e/v6e: 128 MiB -> larger blocks amortize per-grid-step overhead.
    return 8 << 20, 100 << 20


def _pick_tiles(rows: int, cols: int, itemsize: int, block_budget: int):
    """Pick (tr, tc): (8,128)-aligned-or-full-extent tiles under the budget."""
    quantum = max(8, 32 // itemsize)  # sublane quantum: f32=8, bf16=16, i8=32

    # Full-width (contiguous HBM burst) whenever a quantum-row slab fits.
    if quantum * cols * itemsize <= block_budget or cols <= 128:
        tc = cols
    else:
        tc = max(128, _round_down(block_budget // (quantum * itemsize), 128))
        tc = min(tc, _cdiv(cols, 128) * 128)

    max_rows = max(quantum, block_budget // max(tc * itemsize, 1))
    if rows <= max_rows:
        tr = rows  # full extent: always a legal block dim
    else:
        tr = max(quantum, _round_down(max_rows, quantum))

    # v7x megacore: if the whole tensor fits one block but rows can split,
    # halve the row tile so both TensorCores get a parallel tile.
    if _cdiv(rows, tr) * _cdiv(cols, tc) < 2 and rows >= 2 * quantum:
        tr = max(quantum, quantum * _cdiv(_cdiv(rows, 2), quantum))

    return tr, tc


def add_const(x_nchw: jax.Array, const_c) -> jax.Array:
    """Elementwise `x + const`, const per-channel (C,) or scalar, NCHW input."""
    n, c, h, w = x_nchw.shape

    const = jnp.asarray(const_c)
    if const.ndim == 0 or const.size == 1:
        const = jnp.broadcast_to(const.reshape(()), (c,))
    else:
        const = const.reshape(c)

    # PyTorch-style type promotion (e.g. bf16 input + f32 const -> f32 out).
    out_dtype = jnp.result_type(x_nchw.dtype, const.dtype)
    itemsize = jnp.dtype(out_dtype).itemsize

    if h * w >= 128:
        # Lane-dense spatial: rows = N*C (sublane), cols = H*W (lane).
        rows, cols = n * c, h * w
        x2d = x_nchw.astype(out_dtype).reshape(rows, cols)
        c2d = jnp.broadcast_to(
            const.astype(out_dtype)[None, :], (n, c)
        ).reshape(rows, 1)
        per_row_const = True
    else:
        # Lane-sparse spatial dims: fold channels onto the lane axis and
        # pre-expand const per element (only C*H*W values) -> lane-dense out.
        rows, cols = n, c * h * w
        x2d = x_nchw.astype(out_dtype).reshape(rows, cols)
        c2d = jnp.broadcast_to(
            const.astype(out_dtype)[:, None], (c, h * w)
        ).reshape(1, cols)
        per_row_const = False

    block_budget, vmem_cap = _vmem_budget()
    tr, tc = _pick_tiles(rows, cols, itemsize, block_budget)
    grid = (_cdiv(rows, tr), _cdiv(cols, tc))

    # VMEM: 2 double-buffered (x, out) blocks + tiny const block + slack.
    block_bytes = tr * tc * itemsize
    vmem_limit = int(min(max(4 * block_bytes + (4 << 20), 16 << 20), vmem_cap))

    if per_row_const:
        c_spec = pl.BlockSpec((tr, 1), lambda i, j: (i, 0))
    else:
        c_spec = pl.BlockSpec((1, tc), lambda i, j: (0, j))

    cost = pl.CostEstimate(
        flops=rows * cols,
        transcendentals=0,
        bytes_accessed=2 * rows * cols * itemsize + int(c2d.size) * itemsize,
    )

    out2d = pl.pallas_call(
        _add_kernel,
        out_shape=jax.ShapeDtypeStruct((rows, cols), out_dtype),
        grid_spec=pl.GridSpec(
            grid=grid,
            in_specs=[
                pl.BlockSpec((tr, tc), lambda i, j: (i, j)),
                c_spec,
            ],
            out_specs=pl.BlockSpec((tr, tc), lambda i, j: (i, j)),
        ),
        compiler_params=pltpu.CompilerParams(
            # Pure streaming add, no reduction axis: both axes parallel.
            dimension_semantics=("parallel", "parallel"),
            vmem_limit_bytes=vmem_limit,
        ),
        cost_estimate=cost,
    )(x2d, c2d)

    return out2d.reshape(n, c, h, w)


if __name__ == "__main__":
    key = jax.random.PRNGKey(0)
    kx, kc = jax.random.split(key)

    # Main case: per-channel const, lane-dense spatial dims.
    N, C, H, W = 2, 4, 16, 16
    x = jax.random.normal(kx, (N, C, H, W), dtype=jnp.float32)
    const = jax.random.normal(kc, (C,), dtype=jnp.float32)

    out = add_const(x, const)
    jax.block_until_ready(out)
    ref = x + const[None, :, None, None]
    assert out.shape == x.shape and out.dtype == ref.dtype
    assert jnp.allclose(out, ref, atol=1e-6), "mismatch vs reference"

    # Secondary case: scalar const + lane-sparse spatial (exercises re-layout).
    x2 = jax.random.normal(kx, (2, 4, 4, 4), dtype=jnp.float32)
    const2 = jnp.float32(1.5)
    out2 = add_const(x2, const2)
    jax.block_until_ready(out2)
    assert jnp.allclose(out2, x2 + const2, atol=1e-6), "scalar-const mismatch"

    print("KERNEL_OK")
</pallas_src>

<mosaic_0001>
module attributes {stable_mosaic.version = 11 : i64} {
  func.func @_add_kernel(%arg0: i32, %arg1: i32, %arg2: memref<8x256xf32, #tpu.memory_space<vmem>>, %arg3: memref<8x1xf32, #tpu.memory_space<vmem>>, %arg4: memref<8x256xf32, #tpu.memory_space<vmem>>) attributes {dimension_semantics = [#tpu.dimension_semantics<parallel>, #tpu.dimension_semantics<parallel>], iteration_bounds = array<i64: 1, 1>, scalar_prefetch = 0 : i64, scratch_operands = 0 : i64, tpu.core_type = #tpu.core_type<tc>, window_params = [{transform_indices = @transform_0, window_bounds = array<i64: 8, 256>}, {transform_indices = @transform_1, window_bounds = array<i64: 8, 1>}, {transform_indices = @transform_2, window_bounds = array<i64: 8, 256>}]} {
    %c0 = arith.constant 0 : index
    %c0_0 = arith.constant 0 : index
    %0 = vector.load %arg2[%c0, %c0_0] : memref<8x256xf32, #tpu.memory_space<vmem>>, vector<8x256xf32>
    %c0_1 = arith.constant 0 : index
    %c0_2 = arith.constant 0 : index
    %1 = vector.load %arg3[%c0_1, %c0_2] : memref<8x1xf32, #tpu.memory_space<vmem>>, vector<8x1xf32>
    %2 = vector.broadcast %1 : vector<8x1xf32> to vector<8x256xf32>
    %3 = arith.addf %0, %2 : vector<8x256xf32>
    %c0_3 = arith.constant 0 : index
    %c0_4 = arith.constant 0 : index
    %4 = vector.load %arg4[%c0_3, %c0_4] : memref<8x256xf32, #tpu.memory_space<vmem>>, vector<8x256xf32>
    tpu.vector_store %arg4[%c0_3, %c0_4], %3 {strides = array<i32>} : memref<8x256xf32, #tpu.memory_space<vmem>>, vector<8x256xf32>,
    return
  }
  func.func @transform_0(%arg0: i32, %arg1: i32) -> (i32, i32) {
    %c0_i32 = arith.constant 0 : i32
    return %arg0, %arg1 : i32, i32
  }
  func.func @transform_1(%arg0: i32, %arg1: i32) -> (i32, i32) {
    %c0_i32 = arith.constant 0 : i32
    %c0_i32_0 = arith.constant 0 : i32
    return %arg0, %c0_i32 : i32, i32
  }
  func.func @transform_2(%arg0: i32, %arg1: i32) -> (i32, i32) {
    %c0_i32 = arith.constant 0 : i32
    return %arg0, %arg1 : i32, i32
  }
}

</mosaic_0001>

<bundles_post_ra>
// kernel: tpu_custom_call.1
= control target key start
LH: loop header
LB: loop body
LE: loop exit
PB: predicated region body
PF: predicated region fallthrough
CT: control target
= control target key end

     0   :  { %7 = vsyncpa [#allocation3], 0  ;;  %s148_s0 = inlined_call_operand.hbm [shape: f32[8,256], index: 0, kind: input, shape index: {}]   ;;  %s149_s1 = inlined_call_operand.vmem [shape: f32[8,1], index: 1, kind: input, shape index: {}]   ;;  %s150_s2 = inlined_call_operand.hbm [shape: f32[8,256], index: 2, kind: output, shape index: {}]  }
   0x1   :  { %8 = vsyncpa [#allocation4], 0  ;;  %s103_s9 = smov [#allocation2]   ;;  %s55_s13 = scalar_lea.hbm %s148_s0, 256 }
   0x2   :  { %s15_s10 = sshll.u32 %s103_s9, 4  ;;  %p56_p0 = scmp.ne.s32.totalorder %s148_s0, %s55_s13  ;;  %s16_s10 = int_to_ptr.vmem [resolvable:$true] %s15_s10 }
   0x3   :  { %p59_p1 = scmp.lt.u32.totalorder %s55_s13, %s148_s0 }
   0x5   :  { %p61_p2 = pnand %p59_p1, %p56_p0 }
   0x7   :  { %64 = shalt.err (!%p61_p2)
}
   0x8   :  { %s65_s18 = scalar_lea.vmem %s16_s10, 256  ;;  %p70_p4 = scmp.lt.s32.totalorder %s16_s10, %s16_s10 }
   0x9   :  { %p66_p3 = scmp.ne.s32.totalorder %s16_s10, %s65_s18  ;;  %p71_p5 = scmp.lt.s32.totalorder %s65_s18, %s65_s18 }
   0xb   :  { %p72_p6 = por %p71_p5, %p70_p4 }
   0xd   :  { %p73_p7 = pnand %p72_p6, %p66_p3 }
   0xf   :  { %76 = shalt.err (!%p73_p7)
}
  0x10   :  { %18 = dma.hbm_to_vmem [thread:$0]  %s148_s0, 256, %s16_s10, [#allocation3]  }
  0x11   :  { %99 = dma.done.wait [#allocation3], 256  }
  0x12   :  { %100 = vsyncadd [#allocation3], 4294967040  ;;  %v104_v0 = vmov 0   ;;  %v26_v1 = vld [vmem:[%s149_s1] sm:$0xff]  ;;  %v25_v3 = vld [vmem:[#allocation2 + $0x8] sm:$0xff]  ;;  %s105_s23 = smov [#allocation5]  }
  0x13   :  { %54 = vset.pattern.permute.xlu0 %v104_v0  ;;  %v24_v2 = vld [vmem:[#allocation2] sm:$0xff]  ;;  %s42_s24 = sshll.u32 %s105_s23, 4  ;;  %s43_s24 = int_to_ptr.vmem [resolvable:$true] %s42_s24 }
  0x14   :  { %29 = vperm.xlu0 %54, %v26_v1   ;;  %s77_s0 = scalar_lea.vmem %s43_s24, 256  ;;  %p82_p9 = scmp.lt.s32.totalorder %s43_s24, %s43_s24 }
  0x15   :  { %p78_p8 = scmp.ne.s32.totalorder %s43_s24, %s77_s0  ;;  %p83_p10 = scmp.lt.s32.totalorder %s77_s0, %s77_s0 }
  0x17   :  { %p84_p11 = por %p83_p10, %p82_p9 }
  0x19   :  { %p85_p12 = pnand %p84_p11, %p78_p8 }
  0x93   :  { %v30_v4 = vpop.permute.xlu0 %29 }
  0x94   :  { %v32_v5 = vadd.f32 %v30_v4, %v24_v2  ;;  %v33_v6 = vadd.f32 %v30_v4, %v25_v3 }
  0x96   :  { %34 = vst [vmem:[#allocation5] sm:$0xff] %v32_v5  ;;  %35 = vst [vmem:[#allocation5 + $0x8] sm:$0xff] %v33_v6 }
  0x97   :  { %88 = shalt.err (!%p85_p12)
}
  0x98   :  { %s89_s26 = scalar_lea.hbm %s150_s2, 256 }
  0x99   :  { %p90_p13 = scmp.ne.s32.totalorder %s150_s2, %s89_s26  ;;  %p93_p0 = scmp.lt.u32.totalorder %s89_s26, %s150_s2 }
  0x9b   :  { %p95_p1 = pnand %p93_p0, %p90_p13 }
  0x9d   :  { %98 = shalt.err (!%p95_p1)
}
  0x9e   :  { %45 = dma.vmem_to_hbm [thread:$0]  %s43_s24, 256, %s150_s2, [#allocation4]  }
  0x9f   :  { %101 = dma.done.wait [#allocation4], 256  }
  0xa0   :  { %102 = vsyncadd [#allocation4], 4294967040 }
  0xa1   :  { %49 = vsyncpa [#allocation3], 1 }
  0xa2   :  { %50 = vsyncpa [#allocation4], 1 }

</bundles_post_ra>
